<compile_context>
chip_gen: v6e
topology: v6e:2x2x1
jax: 0.10.0
libtpu: 0.0.40
codegen_flags: <defaults>
</compile_context>

<pallas_src>
import functools
import math

import jax
import jax.numpy as jnp
from jax.experimental import pallas as pl
from jax.experimental.pallas import tpu as pltpu

# EXPANDTIMES is a module-level constant in the reference file (not shown in the
# snippet); it sharpens the sigmoid gate on the soft kernel-size score.
EXPANDTIMES = 10.0


def format_kernel_size_mask(kernel_base, kernel_controller, kernel_size):
    """JAX port of SoftKernelConv2d.format_kernel_size (tiny scalar glue).

    Returns the (K, K) soft mask where mask[r, c] = v[max(r, c)] and
    v = [1, f0, f0, f1, f1, ...] with
    f = sigmoid(EXPANDTIMES * (cumscore - sigmoid(ctrl))).
    """
    k2 = kernel_size // 2
    kernel_p = jax.nn.softmax(kernel_base, axis=1)                    # (1, k2)
    tril = jnp.tril(jnp.ones((k2, k2), kernel_base.dtype))            # torch.tril(ones)
    kernel_score = kernel_p @ tril                                    # (1, k2)
    zeroed = kernel_score - jax.nn.sigmoid(kernel_controller)         # (1, k2)
    fack = jax.nn.sigmoid(zeroed * EXPANDTIMES)                       # (1, k2)
    dup = jnp.repeat(fack[0], 2)                                      # [f0, f0, f1, f1, ...]
    v = jnp.concatenate([jnp.ones((1,), fack.dtype), dup])            # (K,)
    idx = jnp.maximum(jnp.arange(kernel_size)[:, None],
                      jnp.arange(kernel_size)[None, :])
    return v[idx]                                                     # (K, K)


def _round_up(x, m):
    return (x + m - 1) // m * m


def _vmem_limit_bytes():
    """Generation-aware VMEM limit: ~85% of per-TC VMEM, clamped to a sane range."""
    cap = 64 * 1024 * 1024                      # conservative fallback (v7x per-TC)
    try:
        cap = int(pltpu.get_tpu_info().vmem_capacity_bytes)
    except Exception:
        pass
    return max(32 * 1024 * 1024, min(int(cap * 0.85), 112 * 1024 * 1024))


def _pick_row_tile(ho, wo_pad, kc, cout_pad, kh, stride, x_item, out_item,
                   w_bytes, fold_kh, vmem_budget, target_rows=512):
    """Largest row tile TH whose blocks fit the VMEM budget, stopping once the MXU
    M dim (TH * WO_pad) reaches target_rows.  No divisibility constraint: the
    wrapper pads HO up to a multiple of TH."""
    best = 1
    for th in range(1, ho + 1):
        rows = th * wo_pad
        th_in = th if fold_kh else (th - 1) * stride + kh
        vmem = (w_bytes
                + 2 * th_in * wo_pad * kc * x_item           # x block, double-buffered
                + 2 * rows * cout_pad * out_item             # out block, double-buffered
                + (0 if fold_kh else rows * cout_pad * 4))   # f32 scratch accumulator
        if vmem > vmem_budget:
            break
        best = th
        if rows >= target_rows:
            break
    return best


def _conv_fold_kernel(x_ref, w_ref, o_ref):
    """Single-dot kernel: KH and KW both folded into the MXU contraction.

    x_ref : VMEM (1, TH, WO_pad, KH*KW*CIN)
    w_ref : VMEM (KH*KW*CIN, COUT_pad)   (pre-masked, reshaped weights)
    o_ref : VMEM (1, TH, WO_pad, COUT_pad)
    """
    _, th, wo_pad, kc = x_ref.shape
    lhs = x_ref[0].reshape(th * wo_pad, kc)          # free view (WO_pad sublane-aligned)
    out = jnp.dot(lhs, w_ref[...], preferred_element_type=jnp.float32)
    o_ref[0] = out.reshape(th, wo_pad, -1).astype(o_ref.dtype)


def _conv_khloop_kernel(x_ref, w_ref, o_ref, acc_ref, *, KH, TH, stride):
    """KH-loop kernel over a halo'd row block, accumulating into an f32 VMEM
    scratch ('=' on kh==0, '+=' after -> no zero-materialization, no vreg-resident
    accumulator, MRB-friendly back-to-back dots on v7x).

    x_ref   : VMEM (1, TH*stride + KH - 1, WO_pad, KW*CIN)
    w_ref   : VMEM (KH, KW*CIN, COUT_pad)
    o_ref   : VMEM (1, TH, WO_pad, COUT_pad)
    acc_ref : VMEM (TH*WO_pad, COUT_pad) f32 scratch
    """
    wo_pad, kwc = x_ref.shape[2], x_ref.shape[3]
    for kh in range(KH):                              # static offsets -> aligned loads
        if stride == 1:
            slab = x_ref[0, pl.ds(kh, TH), :, :]
        else:
            # TODO(synk): for stride > 1 a wrapper-side space-to-depth of H would
            # make this a contiguous (non-strided) load as well.
            slab = x_ref[0, pl.ds(kh, TH, stride), :, :]
        lhs = slab.reshape(TH * wo_pad, kwc)          # free view
        contrib = jnp.dot(lhs, w_ref[kh], preferred_element_type=jnp.float32)
        if kh == 0:
            acc_ref[...] = contrib
        else:
            acc_ref[...] += contrib
    o_ref[0] = acc_ref[...].reshape(TH, wo_pad, -1).astype(o_ref.dtype)


def soft_kernel_conv2d(x_nchw, weight_oihw, kernel_base, kernel_controller, *,
                       stride=1, padding=0, groups=1,
                       compute_dtype=jnp.bfloat16, fold_kh=None,
                       out_format="NCHW"):
    """Forward pass of SoftKernelConv2d. Input/output are NCHW like PyTorch.

    compute_dtype: MXU compute dtype (default bf16; pass jnp.float32 for exact f32,
                   or None to keep the input dtype). Accumulation is always f32.
    fold_kh:       None = auto (fold KH into the contraction when KW*CIN <= 256).
    out_format:    "NCHW" (default, PyTorch parity) or "NHWC" (skips the post-call
                   layout round trip when the consumer accepts channels-last).
    """
    assert groups == 1  # TODO(synk): grouped conv (groups > 1) not implemented in the Pallas kernel.
    K = weight_oihw.shape[-1]
    mask = format_kernel_size_mask(kernel_base, kernel_controller, K)   # (K, K)
    # Pre-apply the soft mask once in the wrapper (no per-step VPU work in-kernel).
    w_masked = weight_oihw * mask[None, None, :, :]                     # OIHW

    x = jnp.transpose(x_nchw, (0, 2, 3, 1))          # NCHW -> NHWC
    w = jnp.transpose(w_masked, (2, 3, 1, 0))        # OIHW -> HWIO
    if padding:
        x = jnp.pad(x, ((0, 0), (padding, padding), (padding, padding), (0, 0)))

    out_dtype = x_nchw.dtype
    if compute_dtype is None:
        compute_dtype = x_nchw.dtype
    # Cast once, before im2col, so the expanded tensor is already narrow in HBM.
    x = x.astype(compute_dtype)
    w = w.astype(compute_dtype)

    N, Hp, Wp, CIN = x.shape
    KH, KW, _, COUT = w.shape
    HO = (Hp - KH) // stride + 1
    WO = (Wp - KW) // stride + 1

    x_item = jnp.dtype(compute_dtype).itemsize
    out_item = jnp.dtype(out_dtype).itemsize
    # Sublane packing of compute/output dtypes: 8 (f32), 16 (bf16), 32 (int8).
    wo_align = max(32 // x_item, 32 // out_item, 8)
    WO_pad = _round_up(WO, wo_align)                 # free reshapes + unmasked stores
    COUT_pad = _round_up(COUT, 128)                  # lane-dense output

    if fold_kh is None:
        # Fold KH when KW*CIN is small (per-kh full-slab adds would be the binding
        # slot, worst on v5e's single vst slot); keep the KH loop when KWC is
        # already MXU-sized so wrapper im2col HBM blowup stays KW x, not KH*KW x.
        fold_kh = (KW * CIN) <= 256
    # TODO(synk): for memory-bound shapes on v5e, an in-kernel KW unfold from a
    # plain (..., Wp, CIN) slab would avoid the wrapper im2col HBM blowup entirely.

    vmem_limit = _vmem_limit_bytes()
    vmem_budget = int(vmem_limit * 0.8)

    if fold_kh:
        KC = KH * KW * CIN
        w2 = w.reshape(KC, COUT)
        if COUT_pad != COUT:
            w2 = jnp.pad(w2, ((0, 0), (0, COUT_pad - COUT)))
        w_bytes = 2 * KC * COUT_pad * x_item          # conservative (double-buffered)
        TH = _pick_row_tile(HO, WO_pad, KC, COUT_pad, KH, stride, x_item, out_item,
                            w_bytes, True, vmem_budget)
        HO_pad = _round_up(HO, TH)
        n_hb = HO_pad // TH

        # Full im2col: (N, HO, WO, KH*KW*CIN); channel order (kh, kw, cin) matches
        # the weight reshape above.
        cols = [x[:, kh: kh + (HO - 1) * stride + 1: stride,
                    kw: kw + (WO - 1) * stride + 1: stride, :]
                for kh in range(KH) for kw in range(KW)]
        xp = jnp.concatenate(cols, axis=-1)
        xp = jnp.pad(xp, ((0, 0), (0, HO_pad - HO), (0, WO_pad - WO), (0, 0)))
        xp = xp.reshape(N * n_hb, TH, WO_pad, KC)     # contiguous -> free reshape

        x_spec = pl.BlockSpec((1, TH, WO_pad, KC), lambda i: (i, 0, 0, 0))
        w_block = (KC, COUT_pad)
        kernel = _conv_fold_kernel
        scratch = ()
    else:
        KWC = KW * CIN
        w2 = w.reshape(KH, KWC, COUT)
        if COUT_pad != COUT:
            w2 = jnp.pad(w2, ((0, 0), (0, 0), (0, COUT_pad - COUT)))
        w_bytes = 2 * KH * KWC * COUT_pad * x_item
        TH = _pick_row_tile(HO, WO_pad, KWC, COUT_pad, KH, stride, x_item, out_item,
                            w_bytes, False, vmem_budget)
        HO_pad = _round_up(HO, TH)
        n_hb = HO_pad // TH
        TH_in = (TH - 1) * stride + KH

        # im2col along W only: (N, Hp, WO, KW*CIN).
        cols = [x[:, :, kw: kw + (WO - 1) * stride + 1: stride, :] for kw in range(KW)]
        xp = jnp.concatenate(cols, axis=-1)
        xp = jnp.pad(xp, ((0, 0), (0, 0), (0, WO_pad - WO), (0, 0)))
        # Materialize per-row-block halo windows so BlockSpec blocks never overlap:
        # VMEM residency drops from the whole image to O(TH) rows (v7x 64 MiB safe),
        # at the cost of (KH-1) duplicated rows per block in HBM.
        Hp_need = (HO_pad - 1) * stride + KH
        if Hp_need > Hp:
            xp = jnp.pad(xp, ((0, 0), (0, Hp_need - Hp), (0, 0), (0, 0)))
        xp = jnp.stack([xp[:, b * TH * stride: b * TH * stride + TH_in]
                        for b in range(n_hb)], axis=1)        # (N, n_hb, TH_in, WO_pad, KWC)
        xp = xp.reshape(N * n_hb, TH_in, WO_pad, KWC)

        x_spec = pl.BlockSpec((1, TH_in, WO_pad, KWC), lambda i: (i, 0, 0, 0))
        w_block = (KH, KWC, COUT_pad)
        kernel = functools.partial(_conv_khloop_kernel, KH=KH, TH=TH, stride=stride)
        scratch = (pltpu.VMEM((TH * WO_pad, COUT_pad), jnp.float32),)

    flops = 2 * N * HO * WO * KH * KW * CIN * COUT
    bytes_accessed = (int(xp.size) * xp.dtype.itemsize
                      + int(w2.size) * w2.dtype.itemsize
                      + N * HO_pad * WO_pad * COUT_pad * out_item)

    def _call(single_buffer_weights):
        w_idx = lambda i: (0,) * len(w_block)
        if single_buffer_weights:
            # Constant block index across the whole grid -> one resident copy.
            w_spec = pl.BlockSpec(w_block, w_idx, pipeline_mode=pl.Buffered(1))
        else:
            w_spec = pl.BlockSpec(w_block, w_idx)
        return pl.pallas_call(
            kernel,
            out_shape=jax.ShapeDtypeStruct((N * n_hb, TH, WO_pad, COUT_pad), out_dtype),
            grid_spec=pltpu.PrefetchScalarGridSpec(
                num_scalar_prefetch=0,
                grid=(N * n_hb,),
                in_specs=[x_spec, w_spec],
                out_specs=pl.BlockSpec((1, TH, WO_pad, COUT_pad),
                                       lambda i: (i, 0, 0, 0)),
                scratch_shapes=scratch),
            compiler_params=pltpu.CompilerParams(
                dimension_semantics=("parallel",),
                vmem_limit_bytes=vmem_limit),
            cost_estimate=pl.CostEstimate(flops=flops, transcendentals=0,
                                          bytes_accessed=int(bytes_accessed)),
        )(xp, w2)

    try:
        out_padded = _call(True)
    except Exception:
        out_padded = _call(False)   # fall back to default double-buffered weights

    out_nhwc = out_padded.reshape(N, HO_pad, WO_pad, COUT_pad)[:, :HO, :WO, :COUT]
    if out_format == "NHWC":
        # TODO(synk): prefer this when the consumer is channels-last — avoids a full
        # extra HBM round trip for the layout transpose below.
        return out_nhwc
    return jnp.transpose(out_nhwc, (0, 3, 1, 2))     # NHWC -> NCHW


if __name__ == "__main__":
    key = jax.random.PRNGKey(0)
    k_w, k_x, k_b, k_c = jax.random.split(key, 4)

    # Small shapes consistent with the module (conv, NCHW input).
    N, CIN, H, W = 2, 4, 16, 16
    COUT, K = 8, 3
    groups = 1   # SoftKernelConv2d defaults: padding=0, bias=False, groups=1

    # Deterministic parameter init mirroring reset_parameters():
    #   weight ~ kaiming_uniform(a=sqrt(5)); kernel_base, kernel_controller ~ U(-1, 1)
    fan_in = (CIN // groups) * K * K
    bound = math.sqrt(6.0 / ((1.0 + 5.0) * fan_in))
    weight = jax.random.uniform(k_w, (COUT, CIN // groups, K, K), jnp.float32, -bound, bound)
    kernel_base = jax.random.uniform(k_b, (1, K // 2), jnp.float32, -1.0, 1.0)
    kernel_controller = jax.random.uniform(k_c, (1,), jnp.float32, -1.0, 1.0)
    x = jax.random.normal(k_x, (N, CIN, H, W), jnp.float32)

    # Pure-JAX reference: F.conv2d(x, weight * mask, stride, padding, groups).
    mask = format_kernel_size_mask(kernel_base, kernel_controller, K)

    def ref_conv(stride, padding):
        return jax.lax.conv_general_dilated(
            x, weight * mask[None, None, :, :],
            window_strides=(stride, stride),
            padding=[(padding, padding), (padding, padding)],
            dimension_numbers=("NCHW", "OIHW", "NCHW"),
            feature_group_count=groups)

    # 1) Default path: bf16 MXU compute, KH+KW folded into the contraction.
    out_bf16 = soft_kernel_conv2d(x, weight, kernel_base, kernel_controller,
                                  stride=1, padding=0, groups=groups)
    out_bf16 = jax.block_until_ready(out_bf16)
    ref = ref_conv(1, 0)
    assert out_bf16.shape == ref.shape, (out_bf16.shape, ref.shape)
    err = float(jnp.max(jnp.abs(out_bf16 - ref)))
    assert err < 1e-1, f"bf16 fold path: max abs error {err}"

    # 2) Exact f32 check of the KH-loop (scratch-accumulator, halo-block) path.
    out_f32 = soft_kernel_conv2d(x, weight, kernel_base, kernel_controller,
                                 stride=1, padding=0, groups=groups,
                                 compute_dtype=jnp.float32, fold_kh=False)
    out_f32 = jax.block_until_ready(out_f32)
    err = float(jnp.max(jnp.abs(out_f32 - ref)))
    assert err < 2e-4, f"f32 KH-loop path: max abs error {err}"

    # 3) Exact f32 check of the folded path with stride=2, padding=1.
    out_s2 = soft_kernel_conv2d(x, weight, kernel_base, kernel_controller,
                                stride=2, padding=1, groups=groups,
                                compute_dtype=jnp.float32, fold_kh=True)
    out_s2 = jax.block_until_ready(out_s2)
    ref2 = ref_conv(2, 1)
    assert out_s2.shape == ref2.shape, (out_s2.shape, ref2.shape)
    err = float(jnp.max(jnp.abs(out_s2 - ref2)))
    assert err < 2e-4, f"f32 fold path (stride=2, padding=1): max abs error {err}"

    print("KERNEL_OK")
</pallas_src>

<mosaic_0001>
module attributes {stable_mosaic.version = 11 : i64} {
  func.func @_conv_fold_kernel(%arg0: i32, %arg1: memref<1x14x16x36xbf16, #tpu.memory_space<vmem>>, %arg2: memref<36x128xbf16, #tpu.memory_space<vmem>>, %arg3: memref<1x14x16x128xf32, #tpu.memory_space<vmem>>) attributes {dimension_semantics = [#tpu.dimension_semantics<parallel>], iteration_bounds = array<i64: 2>, scalar_prefetch = 0 : i64, scratch_operands = 0 : i64, tpu.core_type = #tpu.core_type<tc>, window_params = [{transform_indices = @transform_0, window_bounds = array<i64: 1, 14, 16, 36>}, {pipeline_mode = #tpu.pipeline_mode<synchronous>, transform_indices = @transform_1, window_bounds = array<i64: 36, 128>}, {transform_indices = @transform_2, window_bounds = array<i64: 1, 14, 16, 128>}]} {
    %c0 = arith.constant 0 : index
    %c0_0 = arith.constant 0 : index
    %c0_1 = arith.constant 0 : index
    %c0_2 = arith.constant 0 : index
    %0 = vector.load %arg1[%c0, %c0_0, %c0_1, %c0_2] : memref<1x14x16x36xbf16, #tpu.memory_space<vmem>>, vector<1x14x16x36xbf16>
    %1 = vector.shape_cast %0 : vector<1x14x16x36xbf16> to vector<14x16x36xbf16>
    %2 = vector.shape_cast %1 : vector<14x16x36xbf16> to vector<224x36xbf16>
    %c0_3 = arith.constant 0 : index
    %c0_4 = arith.constant 0 : index
    %3 = vector.load %arg2[%c0_3, %c0_4] : memref<36x128xbf16, #tpu.memory_space<vmem>>, vector<36x128xbf16>
    %cst = arith.constant dense<0.000000e+00> : vector<224x128xf32>
    %4 = tpu.matmul %2, %3, %cst {dimension_numbers = #tpu.dot_dimension_numbers<[1], [0], [0], [1], [0, 0, 1, 1], [], []>} : vector<224x36xbf16>, vector<36x128xbf16>, vector<224x128xf32> -> vector<224x128xf32>
    %5 = vector.shape_cast %4 : vector<224x128xf32> to vector<14x16x128xf32>
    %c0_5 = arith.constant 0 : index
    %c0_6 = arith.constant 0 : index
    %c0_7 = arith.constant 0 : index
    %c0_8 = arith.constant 0 : index
    %6 = vector.load %arg3[%c0_5, %c0_6, %c0_7, %c0_8] : memref<1x14x16x128xf32, #tpu.memory_space<vmem>>, vector<1x14x16x128xf32>
    %7 = vector.shape_cast %6 : vector<1x14x16x128xf32> to vector<14x16x128xf32>
    %8 = vector.shape_cast %5 : vector<14x16x128xf32> to vector<1x14x16x128xf32>
    tpu.vector_store %arg3[%c0_5, %c0_6, %c0_7, %c0_8], %8 {strides = array<i32>} : memref<1x14x16x128xf32, #tpu.memory_space<vmem>>, vector<1x14x16x128xf32>,
    return
  }
  func.func @transform_0(%arg0: i32) -> (i32, i32, i32, i32) {
    %c0_i32 = arith.constant 0 : i32
    %c0_i32_0 = arith.constant 0 : i32
    %c0_i32_1 = arith.constant 0 : i32
    %c0_i32_2 = arith.constant 0 : i32
    return %arg0, %c0_i32, %c0_i32_0, %c0_i32_1 : i32, i32, i32, i32
  }
  func.func @transform_1(%arg0: i32) -> (i32, i32) {
    %c0_i32 = arith.constant 0 : i32
    %c0_i32_0 = arith.constant 0 : i32
    %c0_i32_1 = arith.constant 0 : i32
    return %c0_i32, %c0_i32_0 : i32, i32
  }
  func.func @transform_2(%arg0: i32) -> (i32, i32, i32, i32) {
    %c0_i32 = arith.constant 0 : i32
    %c0_i32_0 = arith.constant 0 : i32
    %c0_i32_1 = arith.constant 0 : i32
    %c0_i32_2 = arith.constant 0 : i32
    return %arg0, %c0_i32, %c0_i32_0, %c0_i32_1 : i32, i32, i32, i32
  }
}

module attributes {stable_mosaic.version = 11 : i64} {
  func.func @_conv_fold_kernel(%arg0: i32, %arg1: memref<1x14x16x36xbf16, #tpu.memory_space<vmem>>, %arg2: memref<36x128xbf16, #tpu.memory_space<vmem>>, %arg3: memref<1x14x16x128xf32, #tpu.memory_space<vmem>>) attributes {dimension_semantics = [#tpu.dimension_semantics<parallel>], iteration_bounds = array<i64: 2>, scalar_prefetch = 0 : i64, scratch_operands = 0 : i64, tpu.core_type = #tpu.core_type<tc>, window_params = [{transform_indices = @transform_0, window_bounds = array<i64: 1, 14, 16, 36>}, {pipeline_mode = #tpu.pipeline_mode<synchronous>, transform_indices = @transform_1, window_bounds = array<i64: 36, 128>}, {transform_indices = @transform_2, window_bounds = array<i64: 1, 14, 16, 128>}]} {
    %c0 = arith.constant 0 : index
    %c0_0 = arith.constant 0 : index
    %c0_1 = arith.constant 0 : index
    %c0_2 = arith.constant 0 : index
    %0 = vector.load %arg1[%c0, %c0_0, %c0_1, %c0_2] : memref<1x14x16x36xbf16, #tpu.memory_space<vmem>>, vector<1x14x16x36xbf16>
    %1 = vector.shape_cast %0 : vector<1x14x16x36xbf16> to vector<14x16x36xbf16>
    %2 = vector.shape_cast %1 : vector<14x16x36xbf16> to vector<224x36xbf16>
    %c0_3 = arith.constant 0 : index
    %c0_4 = arith.constant 0 : index
    %3 = vector.load %arg2[%c0_3, %c0_4] : memref<36x128xbf16, #tpu.memory_space<vmem>>, vector<36x128xbf16>
    %cst = arith.constant dense<0.000000e+00> : vector<224x128xf32>
    %4 = tpu.matmul %2, %3, %cst {dimension_numbers = #tpu.dot_dimension_numbers<[1], [0], [0], [1], [0, 0, 1, 1], [], []>} : vector<224x36xbf16>, vector<36x128xbf16>, vector<224x128xf32> -> vector<224x128xf32>
    %5 = vector.shape_cast %4 : vector<224x128xf32> to vector<14x16x128xf32>
    %c0_5 = arith.constant 0 : index
    %c0_6 = arith.constant 0 : index
    %c0_7 = arith.constant 0 : index
    %c0_8 = arith.constant 0 : index
    %6 = vector.load %arg3[%c0_5, %c0_6, %c0_7, %c0_8] : memref<1x14x16x128xf32, #tpu.memory_space<vmem>>, vector<1x14x16x128xf32>
    %7 = vector.shape_cast %6 : vector<1x14x16x128xf32> to vector<14x16x128xf32>
    %8 = vector.shape_cast %5 : vector<14x16x128xf32> to vector<1x14x16x128xf32>
    tpu.vector_store %arg3[%c0_5, %c0_6, %c0_7, %c0_8], %8 {strides = array<i32>} : memref<1x14x16x128xf32, #tpu.memory_space<vmem>>, vector<1x14x16x128xf32>,
    return
  }
  func.func @transform_0(%arg0: i32) -> (i32, i32, i32, i32) {
    %c0_i32 = arith.constant 0 : i32
    %c0_i32_0 = arith.constant 0 : i32
    %c0_i32_1 = arith.constant 0 : i32
    %c0_i32_2 = arith.constant 0 : i32
    return %arg0, %c0_i32, %c0_i32_0, %c0_i32_1 : i32, i32, i32, i32
  }
  func.func @transform_1(%arg0: i32) -> (i32, i32) {
    %c0_i32 = arith.constant 0 : i32
    %c0_i32_0 = arith.constant 0 : i32
    %c0_i32_1 = arith.constant 0 : i32
    return %c0_i32, %c0_i32_0 : i32, i32
  }
  func.func @transform_2(%arg0: i32) -> (i32, i32, i32, i32) {
    %c0_i32 = arith.constant 0 : i32
    %c0_i32_0 = arith.constant 0 : i32
    %c0_i32_1 = arith.constant 0 : i32
    %c0_i32_2 = arith.constant 0 : i32
    return %arg0, %c0_i32, %c0_i32_0, %c0_i32_1 : i32, i32, i32, i32
  }
}

</mosaic_0001>

<bundles_post_ra>
// kernel: tpu_custom_call.1
= control target key start
LH: loop header
LB: loop body
LE: loop exit
PB: predicated region body
PF: predicated region fallthrough
CT: control target
= control target key end

     0   :  { %7 = vsyncpa [#allocation3], 0  ;;  %s1187_s0 = inlined_call_operand.hbm [shape: bf16[2,14,16,36], index: 0, kind: input, shape index: {}]   ;;  %s1188_s1 = inlined_call_operand.hbm [shape: bf16[36,128], index: 1, kind: input, shape index: {}]   ;;  %s1189_s2 = inlined_call_operand.hbm [shape: f32[2,14,16,128], index: 2, kind: output, shape index: {}]  }
   0x1   :  { %9 = vsyncpa [#allocation3 + $0x1], 0 }
   0x2   :  { %10 = vsyncpa [#allocation6], 0 }
   0x3   :  { %11 = vsyncpa [#allocation4], 0 }
   0x4   :  { %13 = vsyncpa [#allocation4 + $0x1], 0  ;;  %s942_s9 = smov 0   ;;  %s944_s10 = smov 0  }
   0x5   :  { %s946_s11 = smov 0   ;;  %s948_s12 = smov 0  }
   0x6 LB: > { %s963_s13 = sadd.s32 4294967295, %s918_s12   ;;  %s613_s14 = sadd.s32 4294967294, %s918_s12   ;;  %s918_s12 = sphi %s948_s12, %s1211_s12   ;;  %s914_s11 = sphi %s946_s11, %s1210_s11   ;;  %s910_s10 = sphi %s944_s10, %s1209_s10   ;;  %s906_s9 = sphi %s942_s9, %s1208_s9  }
   0x7   : > { %p39_p0 = scmp.ne.s32.totalorder %s910_s10, %s906_s9  ;;  %p1190_p1 = scmp.eq.s32.totalorder %s963_s13, 0 }
   0x8   : > { %p90_p3 = scmp.eq.s32.totalorder %s613_s14, 1  ;;  %p614_p5 = scmp.ge.s32.totalorder %s918_s12, 1 }
   0x9   : > { %p972_p4 = por %p1190_p1, %p39_p0  ;;  %p97_p7 = scmp.lt.s32.totalorder %s918_s12, 3 }
   0xa   : > { %p977_p6 = por %p90_p3, %p39_p0  ;;  %s920_s18 = smov [#allocation5]  }
   0xb   : > { %s1194_s15 = scalar_select %p972_p4, 1, 0 }
   0xc   : > { %s1195_s16 = scalar_select %p977_p6, 1, 0 }
   0xd   : > { %p982_p8 = pnand %p614_p5, %p97_p7  ;;  %s109_s19 = sshll.u32 %s920_s18, 4  ;;  %s110_s19 = int_to_ptr.vmem [resolvable:$true] %s109_s19 }
   0xe   : > { %s996_s21 = sadd.s32 1, %s918_s12   ;;  %s26_s22 = sadd.s32 1, %s914_s11 }
   0xf   : > { %s1196_s17 = scalar_select %p982_p8, 1, 0 }
  0x10   : > { %p726_p9 = pneg %p982_p8  ;;  %s23_s23 = ssub.s32 %s918_s12, %s996_s21 }
  0x11   : > { %s807_s24 = scalar_lea.vmem %s110_s19, 320  ;;  %p815_p5 = scmp.lt.s32.totalorder %s110_s19, %s110_s19 }
  0x12   : > { %p991_p11 = pnand %p726_p9, %p1190_p1  ;;  %p808_p13 = scmp.ne.s32.totalorder %s110_s19, %s807_s24 }
  0x13   : > { %p816_p7 = scmp.lt.s32.totalorder %s807_s24, %s807_s24 }
  0x14   : > { %p798_p12 = pneg %p991_p11 }
  0x15   : > { %p817_p10 = por %p816_p7, %p815_p5 }
  0x16   : > { %p810_p0 = pnand %p808_p13, %p798_p12 }
  0x18   : > { %p811_p3 = pneg %p810_p0 }
  0x1a   : > { %p818_p2 = pnand %p817_p10, %p811_p3 }
  0x1c   : > { %821 = shalt.err (!%p818_p2)
}
  0x1d   : > { %s921_s25 = smov 64   ;;  %s922_s26 = smov 4  }
  0x1e   : > { %729 = dma.hbm_to_vmem [thread:$0]  (!%p991_p11), %s1188_s1, 320, %s110_s19, [#allocation6], %s921_s25, %s921_s25, %s922_s26  }
  0x1f   : > { %p24_p2 = scmp.eq.s32.totalorder %s23_s23, 0  ;;  %p33_p9 = scmp.ne.s32.totalorder %s914_s11, %s910_s10 }
  0x20   : > { %p34_p10 = scmp.eq.s32.totalorder %s918_s12, 0  ;;  %p739_p12 = scmp.lt.s32.totalorder %s918_s12, 2 }
  0x21   : > { %s1016_s29 = scalar_select %p24_p2, %s914_s11, %s26_s22  }
  0x22   : > { %p35_p13 = por %p34_p10, %p33_p9  ;;  %p1198_p0 = scmp.eq.s32.totalorder %s963_s13, 1 }
  0x23   : > { %s123_s3 = sand.u32 1, %s914_s11   ;;  %s714_s4 = smul.u32 1792, %s918_s12 }
  0x24   : > { %p1020_p3 = por %p1198_p0, %p33_p9  ;;  %s713_s5 = smul.u32 112, %s123_s3 }
  0x25   : > { %p1026_p5 = pnand %p739_p12, %p35_p13  ;;  %s1033_s14 = scalar_lea.hbm %s1187_s0, %s714_s4 }
  0x26   : > { %s1199_s30 = scalar_select %p1020_p3, 1, 0 }
  0x27   : > { %s127_s18 = scalar_lea.vmem [#allocation2], %s713_s5  ;;  %s1037_s20 = scalar_lea.sflag [#allocation3], %s123_s3 }
  0x28   : > { %s134_s19 = sshll.u32 %s127_s18, 4  ;;  %s822_s22 = scalar_lea.hbm %s1033_s14, 1792  ;;  %s1035_s19 = int_to_ptr.vmem [resolvable:$true] %s134_s19 }
  0x29   : > { %p823_p11 = scmp.ne.s32.totalorder %s1033_s14, %s822_s22  ;;  %p824_p7 = pneg %p1026_p5 }
  0x2a   : > { %s827_s27 = scalar_lea.hbm %s1187_s0, 3584  ;;  %p828_p10 = scmp.lt.s32.totalorder %s1033_s14, %s1187_s0 }
  0x2b   : > { %p825_p2 = pnand %p824_p7, %p823_p11  ;;  %p829_p12 = scmp.lt.s32.totalorder %s827_s27, %s822_s22 }
  0x2d   : > { %p826_p9 = pneg %p825_p2  ;;  %p830_p13 = por %p829_p12, %p828_p10 }
  0x2f   : > { %p831_p0 = pnand %p830_p13, %p826_p9 }
  0x31   : > { %834 = shalt.err (!%p831_p0)
}
  0x32   : > { %s835_s3 = scalar_lea.vmem %s1035_s19, 1792  ;;  %s923_s5 = smov [#allocation2]  }
  0x33   : > { %p836_p1 = scmp.ne.s32.totalorder %s1035_s19, %s835_s3  ;;  %s840_s7 = sshll.u32 %s923_s5, 4  ;;  %s841_s7 = int_to_ptr.vmem [resolvable:$false] %s840_s7 }
  0x34   : > { %s842_s8 = scalar_lea.vmem %s841_s7, 3584  ;;  %p843_p2 = scmp.lt.s32.totalorder %s1035_s19, %s841_s7 }
  0x35   : > { %p838_p6 = pnand %p836_p1, %p824_p7  ;;  %p844_p3 = scmp.lt.s32.totalorder %s842_s8, %s835_s3 }
  0x37   : > { %p839_p11 = pneg %p838_p6  ;;  %p845_p4 = por %p844_p3, %p843_p2 }
  0x39   : > { %p846_p8 = pnand %p845_p4, %p839_p11 }
  0x3b   : > { %849 = shalt.err (!%p846_p8)
}
  0x3c   : > { %733 = dma.hbm_to_vmem [thread:$0]  (!%p1026_p5), %s1033_s14, 1792, %s1035_s19, %s1037_s20, %s921_s25, %s921_s25, %s922_s26  }
  0x3d   : > { %p1201_p1 = scmp.ne.s32.totalorder %s1196_s17, 0 }
  0x3e   : > { %s1064_s18 = sand.u32 (!%p1201_p1), 1, %s910_s10   ;;  %p1202_p4 = scmp.ne.s32.totalorder (!%p1201_p1), %s1194_s15, 0 }
  0x3f   : > { %146 = sbr.rel (%p1201_p1) target bundleno = 322 (0x142), region = 28  ;;  %s149_s23 = scalar_lea.sflag (!%p1201_p1), [#allocation3], %s1064_s18 }
  0x40   : > { %s715_s22 = smul.u32 (!%p1201_p1), 112, %s1064_s18 }
  0x42   : > { %s1068_s24 = scalar_lea.vmem (!%p1201_p1), [#allocation2], %s715_s22 }
  0x44   : > { %893 = dma.done.wait (%p1202_p4), %s149_s23, 1792  }
  0x45   : > { %895 = vsyncadd (%p1202_p4), %s149_s23, 4294965504  ;;  %p1203_p6 = scmp.eq.s32.totalorder %s963_s13, 0 }
  0x47   : > { %897 = dma.done.wait (%p1203_p6), [#allocation6], 320   ;;  %p1204_p8 = pmov %p1203_p6 }
  0x48   : > { %vm339_vm0 = vcmask 1041408   ;;  %v779_v0 = vld [vmem:[#allocation5 + $0x10] ss:$0 sps:$4 sm:$0x33]   ;;  %v780_v1 = vld [vmem:[#allocation5 + $0x8] sm:$0xff]   ;;  %vm296_vm1 = vcmask 293888  }
  0x49   : > { %899 = vsyncadd (%p1204_p8), [#allocation6], 4294966976  ;;  %711 = vmatprep.subr.msk.bf16.mxu0 %vm339_vm0, %v779_v0  ;;  %v341_v2 = vsel %vm339_vm0, %v779_v0, 0  ;;  %712 = vmatprep.subr.msk.bf16.mxu1 %vm339_vm0, %v779_v0  ;;  %v782_v3 = vld [vmem:[%s1068_s24] sm:$0xff]   ;;  %v783_v6 = vld [vmem:[%s1068_s24 + $0x8] sm:$0xff]   ;;  %s716_s15 = smul.u32 224, %s1064_s18 }
  0x4a   : > { %672 = vmatpush3.bf16.msra.mxu0 %v341_v2  ;;  %708 = vmatpush3.bf16.msra.mxu1 %v341_v2  ;;  %v781_v4 = vld [vmem:[#allocation5] sm:$0xff]   ;;  %v785_v7 = vld [vmem:[%s1068_s24 + $0x48] sm:$0xff]   ;;  %v787_v10 = vld [vmem:[%s1068_s24 + $0x18] sm:$0xff]   ;;  %s717_s25 = smul.u32 3584, %s963_s13  ;;  %s517_s20 = scalar_lea.sflag [#allocation4], %s1064_s18 }
  0x4b   : > { %673 = vmatprep.subr.bf16.mxu0 %v780_v1  ;;  %706 = vmatprep.subr.bf16.mxu1 %v780_v1  ;;  %v784_v5 = vld [vmem:[%s1068_s24 + $0x40] sm:$0xff]   ;;  %v786_v8 = vld [vmem:[%s1068_s24 + $0x10] sm:$0xff]   ;;  %v789_v11 = vld [vmem:[%s1068_s24 + $0x58] sm:$0xff]   ;;  %s1107_s17 = scalar_lea.vmem [#allocation7], %s716_s15  ;;  %p1205_p5 = scmp.ne.s32.totalorder %s1199_s30, 0 }
  0x4c   : > { %677 = vmatprep.mubr.msk.bf16.mxu0 %vm296_vm1, %v782_v3  ;;  %693 = vmatprep.mubr.msk.bf16.mxu1 %vm296_vm1, %v784_v5  ;;  %v788_v9 = vld [vmem:[%s1068_s24 + $0x50] sm:$0xff]   ;;  %v790_v12 = vld [vmem:[%s1068_s24 + $0x20] sm:$0xff]   ;;  %v791_v14 = vld [vmem:[%s1068_s24 + $0x28] sm:$0xff]   ;;  %s530_s26 = sshll.u32 %s1107_s17, 4  ;;  %s1140_s19 = scalar_lea.hbm %s1189_s2, %s717_s25  ;;  %s1142_s26 = int_to_ptr.vmem [resolvable:$true] %s530_s26 }
  0x4d   : > { %v792_v13 = vld [vmem:[%s1068_s24 + $0x60] sm:$0xff]   ;;  %v793_v15 = vld [vmem:[%s1068_s24 + $0x68] sm:$0xff]   ;;  %v794_v16 = vld [vmem:[%s1068_s24 + $0x30] sm:$0xff]   ;;  %s850_s13 = scalar_lea.vmem %s1142_s26, 3584  ;;  %s924_s27 = smov [#allocation7]  }
  0x4e   : > { %674 = vmatpush3.bf16.msra.mxu0 %v780_v1  ;;  %709 = vmatpush3.bf16.msra.mxu1 %v780_v1  ;;  %v795_v17 = vld [vmem:[%s1068_s24 + $0x38] sm:$0xff]   ;;  %p851_p3 = scmp.ne.s32.totalorder %s1142_s26, %s850_s13  ;;  %s854_s28 = sshll.u32 %s924_s27, 4  ;;  %s855_s28 = int_to_ptr.vmem [resolvable:$false] %s854_s28 }
  0x4f   : > { %675 = vmatprep.subr.bf16.mxu0 %v781_v4  ;;  %707 = vmatprep.subr.bf16.mxu1 %v781_v4  ;;  %s856_s4 = scalar_lea.vmem %s855_s28, 7168  ;;  %p857_p10 = scmp.lt.s32.totalorder %s1142_s26, %s855_s28 }
  0x50   : > { %p852_p7 = pnand %p851_p3, %p1205_p5  ;;  %p858_p12 = scmp.lt.s32.totalorder %s856_s4, %s850_s13 }
  0x52   : > { %676 = vmatpush3.bf16.msra.mxu0 %v781_v4  ;;  %710 = vmatpush3.bf16.msra.mxu1 %v781_v4  ;;  %p853_p9 = pneg %p852_p7  ;;  %p859_p13 = por %p858_p12, %p857_p10 }
  0x54   : > { %p860_p0 = pnand %p859_p13, %p853_p9 }
  0x55   : > { %678 = vmatmul.mubr.msk.bf16.vlgmr.msra.gmra.mxu0 %vm296_vm1, %v783_v6  ;;  %694 = vmatmul.mubr.msk.bf16.vlgmr.msra.gmra.mxu1 %vm296_vm1, %v785_v7 }
  0x56   : > { %681 = vmatprep.mubr.msk.bf16.mxu0 %vm296_vm1, %v786_v8  ;;  %697 = vmatprep.mubr.msk.bf16.mxu1 %vm296_vm1, %v788_v9 }
  0x5d   : > { %682 = vmatmul.mubr.msk.bf16.gmra.mxu0 %vm296_vm1, %v787_v10  ;;  %698 = vmatmul.mubr.msk.bf16.gmra.mxu1 %vm296_vm1, %v789_v11 }
  0x5e   : > { %685 = vmatprep.mubr.msk.bf16.mxu0 %vm296_vm1, %v790_v12  ;;  %701 = vmatprep.mubr.msk.bf16.mxu1 %vm296_vm1, %v792_v13 }
  0x65   : > { %686 = vmatmul.mubr.msk.bf16.gmra.mxu0 %vm296_vm1, %v791_v14  ;;  %702 = vmatmul.mubr.msk.bf16.gmra.mxu1 %vm296_vm1, %v793_v15 }
  0x66   : > { %689 = vmatprep.mubr.msk.bf16.mxu0 %vm296_vm1, %v794_v16 }
  0x6d   : > { %690 = vmatmul.mubr.msk.bf16.gmra.mxu0 %vm296_vm1, %v795_v17 }
 0x115   : > { %v679_v18 = vpop.f32.mrf.mxu0  ;;  %v695_v19 = vpop.f32.mrf.mxu1 }
 0x116   : > { %490 = vst [vmem:[%s1107_s17 + $0x10] sm:$0xff] %v679_v18  ;;  %506 = vst [vmem:[%s1107_s17 + $0x90] sm:$0xff] %v695_v19 }
 0x117   : > { %v377_v20 = vpop.f32.mrf.mxu0  ;;  %v441_v21 = vpop.f32.mrf.mxu1 }
 0x118   : > { %488 = vst [vmem:[%s1107_s17] sm:$0xff] %v377_v20  ;;  %504 = vst [vmem:[%s1107_s17 + $0x80] sm:$0xff] %v441_v21 }
 0x119   : > { %v680_v22 = vpop.f32.mrf.mxu0  ;;  %v696_v23 = vpop.f32.mrf.mxu1 }
 0x11a   : > { %491 = vst [vmem:[%s1107_s17 + $0x18] sm:$0xff] %v680_v22  ;;  %507 = vst [vmem:[%s1107_s17 + $0x98] sm:$0xff] %v696_v23 }
 0x11b   : > { %v380_v24 = vpop.f32.mrf.mxu0  ;;  %v444_v25 = vpop.f32.mrf.mxu1 }
 0x11c   : > { %489 = vst [vmem:[%s1107_s17 + $0x8] sm:$0xff] %v380_v24  ;;  %505 = vst [vmem:[%s1107_s17 + $0x88] sm:$0xff] %v444_v25 }
 0x11d   : > { %v683_v26 = vpop.f32.mrf.mxu0  ;;  %v699_v27 = vpop.f32.mrf.mxu1 }
 0x11e   : > { %494 = vst [vmem:[%s1107_s17 + $0x30] sm:$0xff] %v683_v26  ;;  %510 = vst [vmem:[%s1107_s17 + $0xb0] sm:$0xff] %v699_v27 }
 0x11f   : > { %v393_v28 = vpop.f32.mrf.mxu0  ;;  %v457_v29 = vpop.f32.mrf.mxu1 }
 0x120   : > { %492 = vst [vmem:[%s1107_s17 + $0x20] sm:$0xff] %v393_v28  ;;  %508 = vst [vmem:[%s1107_s17 + $0xa0] sm:$0xff] %v457_v29 }
 0x121   : > { %v684_v30 = vpop.f32.mrf.mxu0  ;;  %v700_v31 = vpop.f32.mrf.mxu1 }
 0x122   : > { %495 = vst [vmem:[%s1107_s17 + $0x38] sm:$0xff] %v684_v30  ;;  %511 = vst [vmem:[%s1107_s17 + $0xb8] sm:$0xff] %v700_v31 }
 0x123   : > { %v396_v32 = vpop.f32.mrf.mxu0  ;;  %v460_v33 = vpop.f32.mrf.mxu1 }
 0x124   : > { %493 = vst [vmem:[%s1107_s17 + $0x28] sm:$0xff] %v396_v32  ;;  %509 = vst [vmem:[%s1107_s17 + $0xa8] sm:$0xff] %v460_v33 }
 0x125   : > { %v687_v34 = vpop.f32.mrf.mxu0  ;;  %v703_v35 = vpop.f32.mrf.mxu1 }
 0x126   : > { %498 = vst [vmem:[%s1107_s17 + $0x50] sm:$0xff] %v687_v34  ;;  %514 = vst [vmem:[%s1107_s17 + $0xd0] sm:$0xff] %v703_v35 }
 0x127   : > { %v409_v36 = vpop.f32.mrf.mxu0  ;;  %v473_v37 = vpop.f32.mrf.mxu1 }
 0x128   : > { %496 = vst [vmem:[%s1107_s17 + $0x40] sm:$0xff] %v409_v36  ;;  %512 = vst [vmem:[%s1107_s17 + $0xc0] sm:$0xff] %v473_v37 }
 0x129   : > { %v688_v38 = vpop.f32.mrf.mxu0  ;;  %v704_v39 = vpop.f32.mrf.mxu1 }
 0x12a   : > { %499 = vst [vmem:[%s1107_s17 + $0x58] sm:$0xff] %v688_v38  ;;  %515 = vst [vmem:[%s1107_s17 + $0xd8] sm:$0xff] %v704_v39 }
 0x12b   : > { %v412_v40 = vpop.f32.mrf.mxu0  ;;  %v476_v41 = vpop.f32.mrf.mxu1 }
 0x12c   : > { %497 = vst [vmem:[%s1107_s17 + $0x48] sm:$0xff] %v412_v40  ;;  %513 = vst [vmem:[%s1107_s17 + $0xc8] sm:$0xff] %v476_v41 }
 0x12d   : > { %v691_v42 = vpop.f32.mrf.mxu0 }
 0x12e   : > { %502 = vst [vmem:[%s1107_s17 + $0x70] sm:$0xff] %v691_v42 }
 0x12f   : > { %v425_v43 = vpop.f32.mrf.mxu0 }
 0x130   : > { %500 = vst [vmem:[%s1107_s17 + $0x60] sm:$0xff] %v425_v43 }
 0x131   : > { %v692_v44 = vpop.f32.mrf.mxu0 }
 0x132   : > { %503 = vst [vmem:[%s1107_s17 + $0x78] sm:$0xff] %v692_v44 }
 0x133   : > { %v428_v45 = vpop.f32.mrf.mxu0 }
 0x134   : > { %501 = vst [vmem:[%s1107_s17 + $0x68] sm:$0xff] %v428_v45 }
 0x135   : > { %863 = shalt.err (!%p860_p0)
}
 0x136   : > { %s864_s3 = scalar_lea.hbm %s1140_s19, 3584  ;;  %s868_s8 = scalar_lea.hbm %s1189_s2, 7168 }
 0x137   : > { %p865_p11 = scmp.ne.s32.totalorder %s1140_s19, %s864_s3  ;;  %p869_p4 = scmp.lt.s32.totalorder %s1140_s19, %s1189_s2 }
 0x138   : > { %p870_p6 = scmp.lt.s32.totalorder %s868_s8, %s864_s3 }
 0x139   : > { %p866_p2 = pnand %p865_p11, %p1205_p5 }
 0x13a   : > { %p871_p8 = por %p870_p6, %p869_p4 }
 0x13b   : > { %p867_p1 = pneg %p866_p2 }
 0x13d   : > { %p872_p3 = pnand %p871_p8, %p867_p1 }
 0x13f   : > { %875 = shalt.err (!%p872_p3)
}
 0x140   : > { %s925_s24 = smov 128   ;;  %s926_s15 = smov 8  }
 0x141   : > { %724 = dma.vmem_to_hbm [thread:$0]  (%p1205_p5), %s1142_s26, 3584, %s1140_s19, %s517_s20, %s925_s24, %s925_s24, %s926_s15  }
 0x142 PF: > { %s545_s17 = sand.u32 1, %s906_s9   ;;  %p1206_p7 = scmp.ne.s32.totalorder %s1195_s16, 0 }
 0x143   : > { %p1207_p9 = scmp.ge.s32.totalorder %s918_s12, 2  ;;  %s546_s25 = scalar_lea.sflag [#allocation4], %s545_s17 }
 0x145   : > { %p735_p10 = pnand %p1207_p9, %p1206_p7 }
 0x147   : > { %p736_p12 = pneg %p735_p10 }
 0x149   : > { %901 = dma.done.wait (%p736_p12), %s546_s25, 3584  }
 0x14a   : > { %903 = vsyncadd (%p736_p12), %s546_s25, 4294963712  ;;  %p16_p13 = scmp.ge.s32.totalorder %s996_s21, 4   ;;  %s1208_s9 = smov %s910_s10 }
 0x14b   : > { %s1209_s10 = smov %s914_s11  ;;  %s1210_s11 = smov %s1016_s29 }
 0x14c   : > { %s1211_s12 = smov %s996_s21  ;;  %18 = sbr.rel (!%p16_p13) target bundleno = 6 (0x6), region = 77 }
 0x151   :  { %551 = vsyncpa [#allocation3], 1 }
 0x152   :  { %553 = vsyncpa [#allocation3 + $0x1], 1 }
 0x153   :  { %554 = vsyncpa [#allocation6], 1 }
 0x154   :  { %555 = vsyncpa [#allocation4], 1 }
 0x155   :  { %557 = vsyncpa [#allocation4 + $0x1], 1 }

// kernel: tpu_custom_call.1
= control target key start
LH: loop header
LB: loop body
LE: loop exit
PB: predicated region body
PF: predicated region fallthrough
CT: control target
= control target key end

     0   :  { %7 = vsyncpa [#allocation3], 0  ;;  %s1187_s0 = inlined_call_operand.hbm [shape: bf16[2,14,16,36], index: 0, kind: input, shape index: {}]   ;;  %s1188_s1 = inlined_call_operand.hbm [shape: bf16[36,128], index: 1, kind: input, shape index: {}]   ;;  %s1189_s2 = inlined_call_operand.hbm [shape: f32[2,14,16,128], index: 2, kind: output, shape index: {}]  }
   0x1   :  { %9 = vsyncpa [#allocation3 + $0x1], 0 }
   0x2   :  { %10 = vsyncpa [#allocation6], 0 }
   0x3   :  { %11 = vsyncpa [#allocation4], 0 }
   0x4   :  { %13 = vsyncpa [#allocation4 + $0x1], 0  ;;  %s942_s9 = smov 0   ;;  %s944_s10 = smov 0  }
   0x5   :  { %s946_s11 = smov 0   ;;  %s948_s12 = smov 0  }
   0x6 LB: > { %s963_s13 = sadd.s32 4294967295, %s918_s12   ;;  %s613_s14 = sadd.s32 4294967294, %s918_s12   ;;  %s918_s12 = sphi %s948_s12, %s1211_s12   ;;  %s914_s11 = sphi %s946_s11, %s1210_s11   ;;  %s910_s10 = sphi %s944_s10, %s1209_s10   ;;  %s906_s9 = sphi %s942_s9, %s1208_s9  }
   0x7   : > { %p39_p0 = scmp.ne.s32.totalorder %s910_s10, %s906_s9  ;;  %p1190_p1 = scmp.eq.s32.totalorder %s963_s13, 0 }
   0x8   : > { %p90_p3 = scmp.eq.s32.totalorder %s613_s14, 1  ;;  %p614_p5 = scmp.ge.s32.totalorder %s918_s12, 1 }
   0x9   : > { %p972_p4 = por %p1190_p1, %p39_p0  ;;  %p97_p7 = scmp.lt.s32.totalorder %s918_s12, 3 }
   0xa   : > { %p977_p6 = por %p90_p3, %p39_p0  ;;  %s920_s18 = smov [#allocation5]  }
   0xb   : > { %s1194_s15 = scalar_select %p972_p4, 1, 0 }
   0xc   : > { %s1195_s16 = scalar_select %p977_p6, 1, 0 }
   0xd   : > { %p982_p8 = pnand %p614_p5, %p97_p7  ;;  %s109_s19 = sshll.u32 %s920_s18, 4  ;;  %s110_s19 = int_to_ptr.vmem [resolvable:$true] %s109_s19 }
   0xe   : > { %s996_s21 = sadd.s32 1, %s918_s12   ;;  %s26_s22 = sadd.s32 1, %s914_s11 }
   0xf   : > { %s1196_s17 = scalar_select %p982_p8, 1, 0 }
  0x10   : > { %p726_p9 = pneg %p982_p8  ;;  %s23_s23 = ssub.s32 %s918_s12, %s996_s21 }
  0x11   : > { %s807_s24 = scalar_lea.vmem %s110_s19, 320  ;;  %p815_p5 = scmp.lt.s32.totalorder %s110_s19, %s110_s19 }
  0x12   : > { %p991_p11 = pnand %p726_p9, %p1190_p1  ;;  %p808_p13 = scmp.ne.s32.totalorder %s110_s19, %s807_s24 }
  0x13   : > { %p816_p7 = scmp.lt.s32.totalorder %s807_s24, %s807_s24 }
  0x14   : > { %p798_p12 = pneg %p991_p11 }
  0x15   : > { %p817_p10 = por %p816_p7, %p815_p5 }
  0x16   : > { %p810_p0 = pnand %p808_p13, %p798_p12 }
  0x18   : > { %p811_p3 = pneg %p810_p0 }
  0x1a   : > { %p818_p2 = pnand %p817_p10, %p811_p3 }
  0x1c   : > { %821 = shalt.err (!%p818_p2)
}
  0x1d   : > { %s921_s25 = smov 64   ;;  %s922_s26 = smov 4  }
  0x1e   : > { %729 = dma.hbm_to_vmem [thread:$0]  (!%p991_p11), %s1188_s1, 320, %s110_s19, [#allocation6], %s921_s25, %s921_s25, %s922_s26  }
  0x1f   : > { %p24_p2 = scmp.eq.s32.totalorder %s23_s23, 0  ;;  %p33_p9 = scmp.ne.s32.totalorder %s914_s11, %s910_s10 }
  0x20   : > { %p34_p10 = scmp.eq.s32.totalorder %s918_s12, 0  ;;  %p739_p12 = scmp.lt.s32.totalorder %s918_s12, 2 }
  0x21   : > { %s1016_s29 = scalar_select %p24_p2, %s914_s11, %s26_s22  }
  0x22   : > { %p35_p13 = por %p34_p10, %p33_p9  ;;  %p1198_p0 = scmp.eq.s32.totalorder %s963_s13, 1 }
  0x23   : > { %s123_s3 = sand.u32 1, %s914_s11   ;;  %s714_s4 = smul.u32 1792, %s918_s12 }
  0x24   : > { %p1020_p3 = por %p1198_p0, %p33_p9  ;;  %s713_s5 = smul.u32 112, %s123_s3 }
  0x25   : > { %p1026_p5 = pnand %p739_p12, %p35_p13  ;;  %s1033_s14 = scalar_lea.hbm %s1187_s0, %s714_s4 }
  0x26   : > { %s1199_s30 = scalar_select %p1020_p3, 1, 0 }
  0x27   : > { %s127_s18 = scalar_lea.vmem [#allocation2], %s713_s5  ;;  %s1037_s20 = scalar_lea.sflag [#allocation3], %s123_s3 }
  0x28   : > { %s134_s19 = sshll.u32 %s127_s18, 4  ;;  %s822_s22 = scalar_lea.hbm %s1033_s14, 1792  ;;  %s1035_s19 = int_to_ptr.vmem [resolvable:$true] %s134_s19 }
  0x29   : > { %p823_p11 = scmp.ne.s32.totalorder %s1033_s14, %s822_s22  ;;  %p824_p7 = pneg %p1026_p5 }
  0x2a   : > { %s827_s27 = scalar_lea.hbm %s1187_s0, 3584  ;;  %p828_p10 = scmp.lt.s32.totalorder %s1033_s14, %s1187_s0 }
  0x2b   : > { %p825_p2 = pnand %p824_p7, %p823_p11  ;;  %p829_p12 = scmp.lt.s32.totalorder %s827_s27, %s822_s22 }
  0x2d   : > { %p826_p9 = pneg %p825_p2  ;;  %p830_p13 = por %p829_p12, %p828_p10 }
  0x2f   : > { %p831_p0 = pnand %p830_p13, %p826_p9 }
  0x31   : > { %834 = shalt.err (!%p831_p0)
}
  0x32   : > { %s835_s3 = scalar_lea.vmem %s1035_s19, 1792  ;;  %s923_s5 = smov [#allocation2]  }
  0x33   : > { %p836_p1 = scmp.ne.s32.totalorder %s1035_s19, %s835_s3  ;;  %s840_s7 = sshll.u32 %s923_s5, 4  ;;  %s841_s7 = int_to_ptr.vmem [resolvable:$false] %s840_s7 }
  0x34   : > { %s842_s8 = scalar_lea.vmem %s841_s7, 3584  ;;  %p843_p2 = scmp.lt.s32.totalorder %s1035_s19, %s841_s7 }
  0x35   : > { %p838_p6 = pnand %p836_p1, %p824_p7  ;;  %p844_p3 = scmp.lt.s32.totalorder %s842_s8, %s835_s3 }
  0x37   : > { %p839_p11 = pneg %p838_p6  ;;  %p845_p4 = por %p844_p3, %p843_p2 }
  0x39   : > { %p846_p8 = pnand %p845_p4, %p839_p11 }
  0x3b   : > { %849 = shalt.err (!%p846_p8)
}
  0x3c   : > { %733 = dma.hbm_to_vmem [thread:$0]  (!%p1026_p5), %s1033_s14, 1792, %s1035_s19, %s1037_s20, %s921_s25, %s921_s25, %s922_s26  }
  0x3d   : > { %p1201_p1 = scmp.ne.s32.totalorder %s1196_s17, 0 }
  0x3e   : > { %s1064_s18 = sand.u32 (!%p1201_p1), 1, %s910_s10   ;;  %p1202_p4 = scmp.ne.s32.totalorder (!%p1201_p1), %s1194_s15, 0 }
  0x3f   : > { %146 = sbr.rel (%p1201_p1) target bundleno = 322 (0x142), region = 28  ;;  %s149_s23 = scalar_lea.sflag (!%p1201_p1), [#allocation3], %s1064_s18 }
  0x40   : > { %s715_s22 = smul.u32 (!%p1201_p1), 112, %s1064_s18 }
  0x42   : > { %s1068_s24 = scalar_lea.vmem (!%p1201_p1), [#allocation2], %s715_s22 }
  0x44   : > { %893 = dma.done.wait (%p1202_p4), %s149_s23, 1792  }
  0x45   : > { %895 = vsyncadd (%p1202_p4), %s149_s23, 4294965504  ;;  %p1203_p6 = scmp.eq.s32.totalorder %s963_s13, 0 }
  0x47   : > { %897 = dma.done.wait (%p1203_p6), [#allocation6], 320   ;;  %p1204_p8 = pmov %p1203_p6 }
  0x48   : > { %vm339_vm0 = vcmask 1041408   ;;  %v779_v0 = vld [vmem:[#allocation5 + $0x10] ss:$0 sps:$4 sm:$0x33]   ;;  %v780_v1 = vld [vmem:[#allocation5 + $0x8] sm:$0xff]   ;;  %vm296_vm1 = vcmask 293888  }
  0x49   : > { %899 = vsyncadd (%p1204_p8), [#allocation6], 4294966976  ;;  %711 = vmatprep.subr.msk.bf16.mxu0 %vm339_vm0, %v779_v0  ;;  %v341_v2 = vsel %vm339_vm0, %v779_v0, 0  ;;  %712 = vmatprep.subr.msk.bf16.mxu1 %vm339_vm0, %v779_v0  ;;  %v782_v3 = vld [vmem:[%s1068_s24] sm:$0xff]   ;;  %v783_v6 = vld [vmem:[%s1068_s24 + $0x8] sm:$0xff]   ;;  %s716_s15 = smul.u32 224, %s1064_s18 }
  0x4a   : > { %672 = vmatpush3.bf16.msra.mxu0 %v341_v2  ;;  %708 = vmatpush3.bf16.msra.mxu1 %v341_v2  ;;  %v781_v4 = vld [vmem:[#allocation5] sm:$0xff]   ;;  %v785_v7 = vld [vmem:[%s1068_s24 + $0x48] sm:$0xff]   ;;  %v787_v10 = vld [vmem:[%s1068_s24 + $0x18] sm:$0xff]   ;;  %s717_s25 = smul.u32 3584, %s963_s13  ;;  %s517_s20 = scalar_lea.sflag [#allocation4], %s1064_s18 }
  0x4b   : > { %673 = vmatprep.subr.bf16.mxu0 %v780_v1  ;;  %706 = vmatprep.subr.bf16.mxu1 %v780_v1  ;;  %v784_v5 = vld [vmem:[%s1068_s24 + $0x40] sm:$0xff]   ;;  %v786_v8 = vld [vmem:[%s1068_s24 + $0x10] sm:$0xff]   ;;  %v789_v11 = vld [vmem:[%s1068_s24 + $0x58] sm:$0xff]   ;;  %s1107_s17 = scalar_lea.vmem [#allocation7], %s716_s15  ;;  %p1205_p5 = scmp.ne.s32.totalorder %s1199_s30, 0 }
  0x4c   : > { %677 = vmatprep.mubr.msk.bf16.mxu0 %vm296_vm1, %v782_v3  ;;  %693 = vmatprep.mubr.msk.bf16.mxu1 %vm296_vm1, %v784_v5  ;;  %v788_v9 = vld [vmem:[%s1068_s24 + $0x50] sm:$0xff]   ;;  %v790_v12 = vld [vmem:[%s1068_s24 + $0x20] sm:$0xff]   ;;  %v791_v14 = vld [vmem:[%s1068_s24 + $0x28] sm:$0xff]   ;;  %s530_s26 = sshll.u32 %s1107_s17, 4  ;;  %s1140_s19 = scalar_lea.hbm %s1189_s2, %s717_s25  ;;  %s1142_s26 = int_to_ptr.vmem [resolvable:$true] %s530_s26 }
  0x4d   : > { %v792_v13 = vld [vmem:[%s1068_s24 + $0x60] sm:$0xff]   ;;  %v793_v15 = vld [vmem:[%s1068_s24 + $0x68] sm:$0xff]   ;;  %v794_v16 = vld [vmem:[%s1068_s24 + $0x30] sm:$0xff]   ;;  %s850_s13 = scalar_lea.vmem %s1142_s26, 3584  ;;  %s924_s27 = smov [#allocation7]  }
  0x4e   : > { %674 = vmatpush3.bf16.msra.mxu0 %v780_v1  ;;  %709 = vmatpush3.bf16.msra.mxu1 %v780_v1  ;;  %v795_v17 = vld [vmem:[%s1068_s24 + $0x38] sm:$0xff]   ;;  %p851_p3 = scmp.ne.s32.totalorder %s1142_s26, %s850_s13  ;;  %s854_s28 = sshll.u32 %s924_s27, 4  ;;  %s855_s28 = int_to_ptr.vmem [resolvable:$false] %s854_s28 }
  0x4f   : > { %675 = vmatprep.subr.bf16.mxu0 %v781_v4  ;;  %707 = vmatprep.subr.bf16.mxu1 %v781_v4  ;;  %s856_s4 = scalar_lea.vmem %s855_s28, 7168  ;;  %p857_p10 = scmp.lt.s32.totalorder %s1142_s26, %s855_s28 }
  0x50   : > { %p852_p7 = pnand %p851_p3, %p1205_p5  ;;  %p858_p12 = scmp.lt.s32.totalorder %s856_s4, %s850_s13 }
  0x52   : > { %676 = vmatpush3.bf16.msra.mxu0 %v781_v4  ;;  %710 = vmatpush3.bf16.msra.mxu1 %v781_v4  ;;  %p853_p9 = pneg %p852_p7  ;;  %p859_p13 = por %p858_p12, %p857_p10 }
  0x54   : > { %p860_p0 = pnand %p859_p13, %p853_p9 }
  0x55   : > { %678 = vmatmul.mubr.msk.bf16.vlgmr.msra.gmra.mxu0 %vm296_vm1, %v783_v6  ;;  %694 = vmatmul.mubr.msk.bf16.vlgmr.msra.gmra.mxu1 %vm296_vm1, %v785_v7 }
  0x56   : > { %681 = vmatprep.mubr.msk.bf16.mxu0 %vm296_vm1, %v786_v8  ;;  %697 = vmatprep.mubr.msk.bf16.mxu1 %vm296_vm1, %v788_v9 }
  0x5d   : > { %682 = vmatmul.mubr.msk.bf16.gmra.mxu0 %vm296_vm1, %v787_v10  ;;  %698 = vmatmul.mubr.msk.bf16.gmra.mxu1 %vm296_vm1, %v789_v11 }
  0x5e   : > { %685 = vmatprep.mubr.msk.bf16.mxu0 %vm296_vm1, %v790_v12  ;;  %701 = vmatprep.mubr.msk.bf16.mxu1 %vm296_vm1, %v792_v13 }
  0x65   : > { %686 = vmatmul.mubr.msk.bf16.gmra.mxu0 %vm296_vm1, %v791_v14  ;;  %702 = vmatmul.mubr.msk.bf16.gmra.mxu1 %vm296_vm1, %v793_v15 }
  0x66   : > { %689 = vmatprep.mubr.msk.bf16.mxu0 %vm296_vm1, %v794_v16 }
  0x6d   : > { %690 = vmatmul.mubr.msk.bf16.gmra.mxu0 %vm296_vm1, %v795_v17 }
 0x115   : > { %v679_v18 = vpop.f32.mrf.mxu0  ;;  %v695_v19 = vpop.f32.mrf.mxu1 }
 0x116   : > { %490 = vst [vmem:[%s1107_s17 + $0x10] sm:$0xff] %v679_v18  ;;  %506 = vst [vmem:[%s1107_s17 + $0x90] sm:$0xff] %v695_v19 }
 0x117   : > { %v377_v20 = vpop.f32.mrf.mxu0  ;;  %v441_v21 = vpop.f32.mrf.mxu1 }
 0x118   : > { %488 = vst [vmem:[%s1107_s17] sm:$0xff] %v377_v20  ;;  %504 = vst [vmem:[%s1107_s17 + $0x80] sm:$0xff] %v441_v21 }
 0x119   : > { %v680_v22 = vpop.f32.mrf.mxu0  ;;  %v696_v23 = vpop.f32.mrf.mxu1 }
 0x11a   : > { %491 = vst [vmem:[%s1107_s17 + $0x18] sm:$0xff] %v680_v22  ;;  %507 = vst [vmem:[%s1107_s17 + $0x98] sm:$0xff] %v696_v23 }
 0x11b   : > { %v380_v24 = vpop.f32.mrf.mxu0  ;;  %v444_v25 = vpop.f32.mrf.mxu1 }
 0x11c   : > { %489 = vst [vmem:[%s1107_s17 + $0x8] sm:$0xff] %v380_v24  ;;  %505 = vst [vmem:[%s1107_s17 + $0x88] sm:$0xff] %v444_v25 }
 0x11d   : > { %v683_v26 = vpop.f32.mrf.mxu0  ;;  %v699_v27 = vpop.f32.mrf.mxu1 }
 0x11e   : > { %494 = vst [vmem:[%s1107_s17 + $0x30] sm:$0xff] %v683_v26  ;;  %510 = vst [vmem:[%s1107_s17 + $0xb0] sm:$0xff] %v699_v27 }
 0x11f   : > { %v393_v28 = vpop.f32.mrf.mxu0  ;;  %v457_v29 = vpop.f32.mrf.mxu1 }
 0x120   : > { %492 = vst [vmem:[%s1107_s17 + $0x20] sm:$0xff] %v393_v28  ;;  %508 = vst [vmem:[%s1107_s17 + $0xa0] sm:$0xff] %v457_v29 }
 0x121   : > { %v684_v30 = vpop.f32.mrf.mxu0  ;;  %v700_v31 = vpop.f32.mrf.mxu1 }
 0x122   : > { %495 = vst [vmem:[%s1107_s17 + $0x38] sm:$0xff] %v684_v30  ;;  %511 = vst [vmem:[%s1107_s17 + $0xb8] sm:$0xff] %v700_v31 }
 0x123   : > { %v396_v32 = vpop.f32.mrf.mxu0  ;;  %v460_v33 = vpop.f32.mrf.mxu1 }
 0x124   : > { %493 = vst [vmem:[%s1107_s17 + $0x28] sm:$0xff] %v396_v32  ;;  %509 = vst [vmem:[%s1107_s17 + $0xa8] sm:$0xff] %v460_v33 }
 0x125   : > { %v687_v34 = vpop.f32.mrf.mxu0  ;;  %v703_v35 = vpop.f32.mrf.mxu1 }
 0x126   : > { %498 = vst [vmem:[%s1107_s17 + $0x50] sm:$0xff] %v687_v34  ;;  %514 = vst [vmem:[%s1107_s17 + $0xd0] sm:$0xff] %v703_v35 }
 0x127   : > { %v409_v36 = vpop.f32.mrf.mxu0  ;;  %v473_v37 = vpop.f32.mrf.mxu1 }
 0x128   : > { %496 = vst [vmem:[%s1107_s17 + $0x40] sm:$0xff] %v409_v36  ;;  %512 = vst [vmem:[%s1107_s17 + $0xc0] sm:$0xff] %v473_v37 }
 0x129   : > { %v688_v38 = vpop.f32.mrf.mxu0  ;;  %v704_v39 = vpop.f32.mrf.mxu1 }
 0x12a   : > { %499 = vst [vmem:[%s1107_s17 + $0x58] sm:$0xff] %v688_v38  ;;  %515 = vst [vmem:[%s1107_s17 + $0xd8] sm:$0xff] %v704_v39 }
 0x12b   : > { %v412_v40 = vpop.f32.mrf.mxu0  ;;  %v476_v41 = vpop.f32.mrf.mxu1 }
 0x12c   : > { %497 = vst [vmem:[%s1107_s17 + $0x48] sm:$0xff] %v412_v40  ;;  %513 = vst [vmem:[%s1107_s17 + $0xc8] sm:$0xff] %v476_v41 }
 0x12d   : > { %v691_v42 = vpop.f32.mrf.mxu0 }
 0x12e   : > { %502 = vst [vmem:[%s1107_s17 + $0x70] sm:$0xff] %v691_v42 }
 0x12f   : > { %v425_v43 = vpop.f32.mrf.mxu0 }
 0x130   : > { %500 = vst [vmem:[%s1107_s17 + $0x60] sm:$0xff] %v425_v43 }
 0x131   : > { %v692_v44 = vpop.f32.mrf.mxu0 }
 0x132   : > { %503 = vst [vmem:[%s1107_s17 + $0x78] sm:$0xff] %v692_v44 }
 0x133   : > { %v428_v45 = vpop.f32.mrf.mxu0 }
 0x134   : > { %501 = vst [vmem:[%s1107_s17 + $0x68] sm:$0xff] %v428_v45 }
 0x135   : > { %863 = shalt.err (!%p860_p0)
}
 0x136   : > { %s864_s3 = scalar_lea.hbm %s1140_s19, 3584  ;;  %s868_s8 = scalar_lea.hbm %s1189_s2, 7168 }
 0x137   : > { %p865_p11 = scmp.ne.s32.totalorder %s1140_s19, %s864_s3  ;;  %p869_p4 = scmp.lt.s32.totalorder %s1140_s19, %s1189_s2 }
 0x138   : > { %p870_p6 = scmp.lt.s32.totalorder %s868_s8, %s864_s3 }
 0x139   : > { %p866_p2 = pnand %p865_p11, %p1205_p5 }
 0x13a   : > { %p871_p8 = por %p870_p6, %p869_p4 }
 0x13b   : > { %p867_p1 = pneg %p866_p2 }
 0x13d   : > { %p872_p3 = pnand %p871_p8, %p867_p1 }
 0x13f   : > { %875 = shalt.err (!%p872_p3)
}
 0x140   : > { %s925_s24 = smov 128   ;;  %s926_s15 = smov 8  }
 0x141   : > { %724 = dma.vmem_to_hbm [thread:$0]  (%p1205_p5), %s1142_s26, 3584, %s1140_s19, %s517_s20, %s925_s24, %s925_s24, %s926_s15  }
 0x142 PF: > { %s545_s17 = sand.u32 1, %s906_s9   ;;  %p1206_p7 = scmp.ne.s32.totalorder %s1195_s16, 0 }
 0x143   : > { %p1207_p9 = scmp.ge.s32.totalorder %s918_s12, 2  ;;  %s546_s25 = scalar_lea.sflag [#allocation4], %s545_s17 }
 0x145   : > { %p735_p10 = pnand %p1207_p9, %p1206_p7 }
 0x147   : > { %p736_p12 = pneg %p735_p10 }
 0x149   : > { %901 = dma.done.wait (%p736_p12), %s546_s25, 3584  }
 0x14a   : > { %903 = vsyncadd (%p736_p12), %s546_s25, 4294963712  ;;  %p16_p13 = scmp.ge.s32.totalorder %s996_s21, 4   ;;  %s1208_s9 = smov %s910_s10 }
 0x14b   : > { %s1209_s10 = smov %s914_s11  ;;  %s1210_s11 = smov %s1016_s29 }
 0x14c   : > { %s1211_s12 = smov %s996_s21  ;;  %18 = sbr.rel (!%p16_p13) target bundleno = 6 (0x6), region = 77 }
 0x151   :  { %551 = vsyncpa [#allocation3], 1 }
 0x152   :  { %553 = vsyncpa [#allocation3 + $0x1], 1 }
 0x153   :  { %554 = vsyncpa [#allocation6], 1 }
 0x154   :  { %555 = vsyncpa [#allocation4], 1 }
 0x155   :  { %557 = vsyncpa [#allocation4 + $0x1], 1 }

</bundles_post_ra>
